<compile_context>
chip_gen: v7x
topology: tpu7x:2x2x1
jax: 0.10.0
libtpu: 0.0.40
codegen_flags: <defaults>
</compile_context>

<pallas_src>
import jax
import jax.numpy as jnp
from jax.experimental import pallas as pl
from jax.experimental.pallas import tpu as pltpu


def _round_up(x, m):
    return (x + m - 1) // m * m


def swiglu_kernel(x_ref, w12_ref, b12_ref, w3_ref, b3_ref, o_ref, acc_ref):
    k = pl.program_id(1)

    @pl.when(k == 0)
    def _init():
        acc_ref[...] = jnp.zeros_like(acc_ref)

    # Fused first projection: one MXU pass producing BOTH SwiGLU halves for this
    # hidden block (f32 accumulation, bias added in f32).
    x12 = jnp.dot(x_ref[...], w12_ref[...],
                  preferred_element_type=jnp.float32) + b12_ref[...]
    th = w12_ref.shape[1] // 2          # static; th is a multiple of 128
    x1 = x12[:, :th]
    x2 = x12[:, th:]
    h = (x1 * jax.nn.sigmoid(x1)) * x2  # SiLU(x1) * x2, kept in f32 (VPU/EUP)

    # Partial second projection for this hidden block; accumulate in f32 VMEM.
    acc_ref[...] += jnp.dot(h.astype(w3_ref.dtype), w3_ref[...],
                            preferred_element_type=jnp.float32)

    @pl.when(k == pl.num_programs(1) - 1)
    def _finalize():
        o_ref[...] = (acc_ref[...] + b3_ref[...]).astype(o_ref.dtype)


def prepare_swiglu_params(w12, b12, w3, b3, *, block_h=512,
                          compute_dtype=jnp.bfloat16):
    """Pre-pack PyTorch-convention weights ONCE at model init.

    w12: (2*hidden, d_in), b12: (2*hidden,), w3: (d_out, hidden), b3: (d_out,)
    """
    two_h, d_in = w12.shape
    hidden = two_h // 2
    d_out, _ = w3.shape

    th = min(block_h, _round_up(hidden, 128))   # hidden block, multiple of 128
    hidden_p = _round_up(hidden, th)
    d_out_p = _round_up(d_out, 128)             # lane-dense output
    nh = hidden_p // th

    w1_t = jnp.zeros((d_in, hidden_p), jnp.float32).at[:, :hidden].set(
        w12[:hidden, :].T.astype(jnp.float32))
    w2_t = jnp.zeros((d_in, hidden_p), jnp.float32).at[:, :hidden].set(
        w12[hidden:, :].T.astype(jnp.float32))
    # Interleave per hidden block so one (d_in, 2*th) tile holds [W1_k | W2_k].
    w12_packed = jnp.stack(
        (w1_t.reshape(d_in, nh, th), w2_t.reshape(d_in, nh, th)), axis=2
    ).reshape(d_in, 2 * hidden_p).astype(compute_dtype)

    b1 = jnp.zeros((hidden_p,), jnp.float32).at[:hidden].set(
        b12[:hidden].astype(jnp.float32))
    b2 = jnp.zeros((hidden_p,), jnp.float32).at[:hidden].set(
        b12[hidden:].astype(jnp.float32))
    b12_packed = jnp.stack(
        (b1.reshape(nh, th), b2.reshape(nh, th)), axis=1
    ).reshape(1, 2 * hidden_p)                               # f32 biases

    w3_t = jnp.zeros((hidden_p, d_out_p), jnp.float32).at[:hidden, :d_out].set(
        w3.T.astype(jnp.float32)).astype(compute_dtype)
    b3_p = jnp.zeros((1, d_out_p), jnp.float32).at[0, :d_out].set(
        b3.astype(jnp.float32))

    return dict(w12=w12_packed, b12=b12_packed, w3=w3_t, b3=b3_p,
                d_in=d_in, hidden=hidden, hidden_p=hidden_p,
                d_out=d_out, d_out_p=d_out_p, th=th,
                compute_dtype=compute_dtype)


def swiglu_ffn(x, params, *, tm=256):
    """x: (..., d_in). params from prepare_swiglu_params()."""
    d_in = params["d_in"]
    assert x.shape[-1] == d_in
    orig_shape = x.shape
    out_dtype = x.dtype

    x2d = x.reshape(-1, d_in)
    n_tok = x2d.shape[0]

    th = params["th"]
    hidden_p = params["hidden_p"]
    d_out = params["d_out"]
    d_out_p = params["d_out_p"]
    cdt = params["compute_dtype"]

    # Token tiling: big tiles for MXU utilization, pad instead of asserting.
    tm_e = min(tm, _round_up(n_tok, 8))
    n_tok_p = _round_up(n_tok, tm_e)
    x_p = jnp.zeros((n_tok_p, d_in), cdt).at[:n_tok].set(x2d.astype(cdt))

    grid = (n_tok_p // tm_e, hidden_p // th)   # reduction (hidden) axis last

    cdt_bytes = jnp.dtype(cdt).itemsize
    out_bytes = jnp.dtype(out_dtype).itemsize
    vmem_est = (
        2 * tm_e * d_in * cdt_bytes                        # x tile (2-buffered)
        + 2 * (d_in * 2 * th + th * d_out_p) * cdt_bytes   # weight tiles
        + 2 * (2 * th + d_out_p) * 4                       # bias tiles
        + 2 * tm_e * d_out_p * out_bytes                   # output tile
        + tm_e * d_out_p * 4                               # f32 accumulator
        + 2 * tm_e * 2 * th * 4                            # x12 / h intermediates
    )
    vmem_limit = int(min(max(2 * vmem_est, 4 << 20), 64 << 20))

    cost = pl.CostEstimate(
        flops=2 * n_tok_p * d_in * 2 * hidden_p + 2 * n_tok_p * hidden_p * d_out_p,
        transcendentals=n_tok_p * hidden_p,
        bytes_accessed=int(x_p.size * cdt_bytes
                           + params["w12"].size * cdt_bytes
                           + params["w3"].size * cdt_bytes
                           + n_tok_p * d_out_p * out_bytes),
    )

    out_p = pl.pallas_call(
        swiglu_kernel,
        out_shape=jax.ShapeDtypeStruct((n_tok_p, d_out_p), out_dtype),
        grid_spec=pltpu.PrefetchScalarGridSpec(
            num_scalar_prefetch=0,
            grid=grid,
            in_specs=[
                pl.BlockSpec((tm_e, d_in), lambda i, k: (i, 0)),     # x (stays resident over k)
                pl.BlockSpec((d_in, 2 * th), lambda i, k: (0, k)),   # fused [W1_k | W2_k]
                pl.BlockSpec((1, 2 * th), lambda i, k: (0, k)),      # fused [b1_k | b2_k]
                pl.BlockSpec((th, d_out_p), lambda i, k: (k, 0)),    # W3 row block
                pl.BlockSpec((1, d_out_p), lambda i, k: (0, 0)),     # b3
            ],
            out_specs=pl.BlockSpec((tm_e, d_out_p), lambda i, k: (i, 0)),
            scratch_shapes=[pltpu.VMEM((tm_e, d_out_p), jnp.float32)],
        ),
        compiler_params=pltpu.CompilerParams(
            dimension_semantics=("parallel", "arbitrary"),
            vmem_limit_bytes=vmem_limit,
        ),
        cost_estimate=cost,
    )(x_p, params["w12"], params["b12"], params["w3"], params["b3"])

    return out_p[:n_tok, :d_out].reshape(*orig_shape[:-1], d_out)


def reference_swiglu(x, w12, b12, w3, b3):
    x12 = jnp.einsum("...i,oi->...o", x, w12) + b12
    hidden = w12.shape[0] // 2
    x1, x2 = x12[..., :hidden], x12[..., hidden:]
    return jnp.einsum("...i,oi->...o", jax.nn.silu(x1) * x2, w3) + b3


if __name__ == "__main__":
    # Small shapes consistent with the module; chosen to exercise token / hidden /
    # output padding paths (none are multiples of the tile sizes).
    batch, seq = 2, 9
    in_features = 48
    hidden_features = 80
    out_features = 48

    key = jax.random.PRNGKey(0)
    kx, k1, k2, k3, k4 = jax.random.split(key, 5)

    x = jax.random.normal(kx, (batch, seq, in_features), dtype=jnp.float32)
    # PyTorch Linear shapes: (out, in) + (out,).
    w12 = jax.random.normal(k1, (2 * hidden_features, in_features),
                            dtype=jnp.float32) * (1.0 / in_features ** 0.5)
    b12 = jax.random.normal(k2, (2 * hidden_features,), dtype=jnp.float32) * 0.02
    w3 = jax.random.normal(k3, (out_features, hidden_features),
                           dtype=jnp.float32) * (1.0 / hidden_features ** 0.5)
    b3 = jax.random.normal(k4, (out_features,), dtype=jnp.float32) * 0.02

    ref = reference_swiglu(x, w12, b12, w3, b3)

    # f32 compute path: tight check of the kernel structure / padding logic.
    params_f32 = prepare_swiglu_params(w12, b12, w3, b3,
                                       compute_dtype=jnp.float32)
    out_f32 = jax.block_until_ready(swiglu_ffn(x, params_f32))
    assert out_f32.shape == (batch, seq, out_features)
    assert jnp.allclose(out_f32, ref, atol=2e-4, rtol=2e-4), "f32 path mismatch"

    # bf16 matmul path (production config): f32 accumulation, looser tolerance.
    params_bf16 = prepare_swiglu_params(w12, b12, w3, b3,
                                        compute_dtype=jnp.bfloat16)
    out_bf16 = jax.block_until_ready(swiglu_ffn(x, params_bf16))
    assert out_bf16.shape == (batch, seq, out_features)
    assert jnp.allclose(out_bf16, ref, atol=5e-2, rtol=5e-2), "bf16 path mismatch"

    print("KERNEL_OK")
</pallas_src>

<mosaic_0001>
module attributes {stable_mosaic.version = 11 : i64} {
  func.func @swiglu_kernel(%arg0: i32, %arg1: i32, %arg2: memref<24x48xf32, #tpu.memory_space<vmem>>, %arg3: memref<48x256xf32, #tpu.memory_space<vmem>>, %arg4: memref<1x256xf32, #tpu.memory_space<vmem>>, %arg5: memref<128x128xf32, #tpu.memory_space<vmem>>, %arg6: memref<1x128xf32, #tpu.memory_space<vmem>>, %arg7: memref<24x128xf32, #tpu.memory_space<vmem>>, %arg8: memref<24x128xf32, #tpu.memory_space<vmem>>) attributes {dimension_semantics = [#tpu.dimension_semantics<parallel>, #tpu.dimension_semantics<arbitrary>], iteration_bounds = array<i64: 1, 1>, scalar_prefetch = 0 : i64, scratch_operands = 1 : i64, tpu.core_type = #tpu.core_type<tc>, window_params = [{transform_indices = @transform_0, window_bounds = array<i64: 24, 48>}, {transform_indices = @transform_1, window_bounds = array<i64: 48, 256>}, {transform_indices = @transform_2, window_bounds = array<i64: 1, 256>}, {transform_indices = @transform_3, window_bounds = array<i64: 128, 128>}, {pipeline_mode = #tpu.pipeline_mode<synchronous>, transform_indices = @transform_4, window_bounds = array<i64: 1, 128>}, {transform_indices = @transform_5, window_bounds = array<i64: 24, 128>}]} {
    %c0_i32 = arith.constant 0 : i32
    %0 = arith.cmpi eq, %arg1, %c0_i32 : i32
    %1 = arith.extui %0 : i1 to i32
    %c0_i32_0 = arith.constant 0 : i32
    %2 = arith.cmpi ne, %1, %c0_i32_0 : i32
    scf.if %2 {
      %cst_16 = arith.constant 0.000000e+00 : f32
      %26 = vector.broadcast %cst_16 : f32 to vector<24x128xf32>
      %c0_17 = arith.constant 0 : index
      %c0_18 = arith.constant 0 : index
      %27 = vector.load %arg8[%c0_17, %c0_18] : memref<24x128xf32, #tpu.memory_space<vmem>>, vector<24x128xf32>
      tpu.vector_store %arg8[%c0_17, %c0_18], %26 {strides = array<i32>} : memref<24x128xf32, #tpu.memory_space<vmem>>, vector<24x128xf32>,
    } else {
    }
    %c0 = arith.constant 0 : index
    %c0_1 = arith.constant 0 : index
    %3 = vector.load %arg2[%c0, %c0_1] : memref<24x48xf32, #tpu.memory_space<vmem>>, vector<24x48xf32>
    %c0_2 = arith.constant 0 : index
    %c0_3 = arith.constant 0 : index
    %4 = vector.load %arg3[%c0_2, %c0_3] : memref<48x256xf32, #tpu.memory_space<vmem>>, vector<48x256xf32>
    %cst = arith.constant dense<0.000000e+00> : vector<24x256xf32>
    %5 = tpu.matmul %3, %4, %cst {dimension_numbers = #tpu.dot_dimension_numbers<[1], [0], [0], [1], [0, 0, 1, 1], [], []>} : vector<24x48xf32>, vector<48x256xf32>, vector<24x256xf32> -> vector<24x256xf32>
    %c0_4 = arith.constant 0 : index
    %c0_5 = arith.constant 0 : index
    %6 = vector.load %arg4[%c0_4, %c0_5] : memref<1x256xf32, #tpu.memory_space<vmem>>, vector<1x256xf32>
    %7 = vector.broadcast %6 : vector<1x256xf32> to vector<24x256xf32>
    %8 = arith.addf %5, %7 : vector<24x256xf32>
    %9 = vector.extract_strided_slice %8 {offsets = [0, 0], sizes = [24, 128], strides = [1, 1]} : vector<24x256xf32> to vector<24x128xf32>
    %10 = vector.extract_strided_slice %8 {offsets = [0, 128], sizes = [24, 128], strides = [1, 1]} : vector<24x256xf32> to vector<24x128xf32>
    %11 = arith.negf %9 : vector<24x128xf32>
    %12 = math.exp %11 : vector<24x128xf32>
    %cst_6 = arith.constant 1.000000e+00 : f32
    %13 = vector.broadcast %cst_6 : f32 to vector<24x128xf32>
    %14 = arith.addf %13, %12 : vector<24x128xf32>
    %15 = arith.divf %13, %14 : vector<24x128xf32>
    %16 = arith.mulf %9, %15 : vector<24x128xf32>
    %17 = arith.mulf %16, %10 : vector<24x128xf32>
    %c0_7 = arith.constant 0 : index
    %c0_8 = arith.constant 0 : index
    %18 = vector.load %arg8[%c0_7, %c0_8] : memref<24x128xf32, #tpu.memory_space<vmem>>, vector<24x128xf32>
    %c0_9 = arith.constant 0 : index
    %c0_10 = arith.constant 0 : index
    %19 = vector.load %arg5[%c0_9, %c0_10] : memref<128x128xf32, #tpu.memory_space<vmem>>, vector<128x128xf32>
    %cst_11 = arith.constant dense<0.000000e+00> : vector<24x128xf32>
    %20 = tpu.matmul %17, %19, %cst_11 {dimension_numbers = #tpu.dot_dimension_numbers<[1], [0], [0], [1], [0, 0, 1, 1], [], []>} : vector<24x128xf32>, vector<128x128xf32>, vector<24x128xf32> -> vector<24x128xf32>
    %21 = arith.addf %18, %20 : vector<24x128xf32>
    %c0_12 = arith.constant 0 : index
    %c0_13 = arith.constant 0 : index
    %22 = vector.load %arg8[%c0_12, %c0_13] : memref<24x128xf32, #tpu.memory_space<vmem>>, vector<24x128xf32>
    tpu.vector_store %arg8[%c0_12, %c0_13], %21 {strides = array<i32>} : memref<24x128xf32, #tpu.memory_space<vmem>>, vector<24x128xf32>,
    %c0_i32_14 = arith.constant 0 : i32
    %23 = arith.cmpi eq, %arg1, %c0_i32_14 : i32
    %24 = arith.extui %23 : i1 to i32
    %c0_i32_15 = arith.constant 0 : i32
    %25 = arith.cmpi ne, %24, %c0_i32_15 : i32
    scf.if %25 {
      %c0_16 = arith.constant 0 : index
      %c0_17 = arith.constant 0 : index
      %26 = vector.load %arg8[%c0_16, %c0_17] : memref<24x128xf32, #tpu.memory_space<vmem>>, vector<24x128xf32>
      %c0_18 = arith.constant 0 : index
      %c0_19 = arith.constant 0 : index
      %27 = vector.load %arg6[%c0_18, %c0_19] : memref<1x128xf32, #tpu.memory_space<vmem>>, vector<1x128xf32>
      %28 = vector.broadcast %27 : vector<1x128xf32> to vector<24x128xf32>
      %29 = arith.addf %26, %28 : vector<24x128xf32>
      %c0_20 = arith.constant 0 : index
      %c0_21 = arith.constant 0 : index
      %30 = vector.load %arg7[%c0_20, %c0_21] : memref<24x128xf32, #tpu.memory_space<vmem>>, vector<24x128xf32>
      tpu.vector_store %arg7[%c0_20, %c0_21], %29 {strides = array<i32>} : memref<24x128xf32, #tpu.memory_space<vmem>>, vector<24x128xf32>,
    } else {
    }
    return
  }
  func.func @transform_0(%arg0: i32, %arg1: i32) -> (i32, i32) {
    %c0_i32 = arith.constant 0 : i32
    %c0_i32_0 = arith.constant 0 : i32
    return %arg0, %c0_i32 : i32, i32
  }
  func.func @transform_1(%arg0: i32, %arg1: i32) -> (i32, i32) {
    %c0_i32 = arith.constant 0 : i32
    %c0_i32_0 = arith.constant 0 : i32
    return %c0_i32, %arg1 : i32, i32
  }
  func.func @transform_2(%arg0: i32, %arg1: i32) -> (i32, i32) {
    %c0_i32 = arith.constant 0 : i32
    %c0_i32_0 = arith.constant 0 : i32
    return %c0_i32, %arg1 : i32, i32
  }
  func.func @transform_3(%arg0: i32, %arg1: i32) -> (i32, i32) {
    %c0_i32 = arith.constant 0 : i32
    %c0_i32_0 = arith.constant 0 : i32
    return %arg1, %c0_i32 : i32, i32
  }
  func.func @transform_4(%arg0: i32, %arg1: i32) -> (i32, i32) {
    %c0_i32 = arith.constant 0 : i32
    %c0_i32_0 = arith.constant 0 : i32
    %c0_i32_1 = arith.constant 0 : i32
    return %c0_i32, %c0_i32_0 : i32, i32
  }
  func.func @transform_5(%arg0: i32, %arg1: i32) -> (i32, i32) {
    %c0_i32 = arith.constant 0 : i32
    %c0_i32_0 = arith.constant 0 : i32
    return %arg0, %c0_i32 : i32, i32
  }
}

</mosaic_0001>

<bundles_post_ra>
// kernel: tpu_custom_call.1
= control target key start
LH: loop header
LB: loop body
LE: loop exit
PB: predicated region body
PF: predicated region fallthrough
CT: control target
= control target key end

     0   :  { %10 = vsyncpa [#allocation4], 0  ;;  %s688_s0 = inlined_call_operand.hbm [shape: f32[24,48], index: 0, kind: input, shape index: {}]   ;;  %s689_s1 = inlined_call_operand.hbm [shape: f32[48,256], index: 1, kind: input, shape index: {}]   ;;  %s690_s2 = inlined_call_operand.vmem [shape: f32[1,256], index: 2, kind: input, shape index: {}]   ;;  %s691_s3 = inlined_call_operand.hbm [shape: f32[128,128], index: 3, kind: input, shape index: {}]   ;;  %s692_s4 = inlined_call_operand.vmem [shape: f32[1,128], index: 4, kind: input, shape index: {}]   ;;  %s693_s5 = inlined_call_operand.hbm [shape: f32[24,128], index: 5, kind: output, shape index: {}]  }
   0x1   :  { %11 = vsyncpa [#allocation7], 0 }
   0x2   :  { %12 = vsyncpa [#allocation5], 0  ;;  %s575_s18 = smov [#allocation6]   ;;  %s481_s22 = scalar_lea.hbm %s689_s1, 1536 }
   0x3   :  { %s30_s19 = sshll.u32 %s575_s18, 4  ;;  %p482_p0 = scmp.ne.s32.totalorder %s689_s1, %s481_s22  ;;  %s31_s19 = int_to_ptr.vmem [resolvable:$true] %s30_s19 }
   0x4   :  { %p485_p1 = scmp.lt.u32.totalorder %s481_s22, %s689_s1 }
   0x6   :  { %p487_p2 = pnand %p485_p1, %p482_p0 }
   0x8   :  { %490 = shalt.err (!%p487_p2)
}
   0x9   :  { %s491_s27 = scalar_lea.vmem %s31_s19, 1536  ;;  %p496_p4 = scmp.lt.s32.totalorder %s31_s19, %s31_s19 }
   0xa   :  { %p492_p3 = scmp.ne.s32.totalorder %s31_s19, %s491_s27  ;;  %p497_p5 = scmp.lt.s32.totalorder %s491_s27, %s491_s27 }
   0xc   :  { %p498_p6 = por %p497_p5, %p496_p4 }
   0xe   :  { %p499_p7 = pnand %p498_p6, %p492_p3 }
  0x10   :  { %502 = shalt.err (!%p499_p7)
}
  0x11   :  { %s576_s28 = smov 256   ;;  %s577_s29 = smov 16  }
  0x12   :  { %36 = dma.hbm_to_vmem [thread:$0]  %s689_s1, 1536, %s31_s19, [#allocation7], %s576_s28, %s576_s28, %s577_s29  }
  0x13   :  { %s578_s7 = smov [#allocation3]   ;;  %s503_s11 = scalar_lea.hbm %s688_s0, 384 }
  0x14   :  { %s18_s8 = sshll.u32 %s578_s7, 4  ;;  %p504_p8 = scmp.ne.s32.totalorder %s688_s0, %s503_s11  ;;  %s19_s8 = int_to_ptr.vmem [resolvable:$true] %s18_s8 }
  0x15   :  { %p507_p9 = scmp.lt.u32.totalorder %s503_s11, %s688_s0 }
  0x17   :  { %p509_p10 = pnand %p507_p9, %p504_p8 }
  0x19   :  { %512 = shalt.err (!%p509_p10)
}
  0x1a   :  { %s513_s16 = scalar_lea.vmem %s19_s8, 384  ;;  %p518_p12 = scmp.lt.s32.totalorder %s19_s8, %s19_s8 }
  0x1b   :  { %p514_p11 = scmp.ne.s32.totalorder %s19_s8, %s513_s16  ;;  %p519_p13 = scmp.lt.s32.totalorder %s513_s16, %s513_s16 }
  0x1d   :  { %p520_p0 = por %p519_p13, %p518_p12 }
  0x1f   :  { %p521_p1 = pnand %p520_p0, %p514_p11 }
  0x21   :  { %524 = shalt.err (!%p521_p1)
}
  0x22   :  { %s579_s1 = smov 128   ;;  %s580_s17 = smov 8  }
  0x23   :  { %24 = dma.hbm_to_vmem [thread:$0]  %s688_s0, 384, %s19_s8, [#allocation4], %s579_s1, %s579_s1, %s580_s17  }
  0x24   :  { %s581_s20 = smov [#allocation8]   ;;  %s525_s24 = scalar_lea.hbm %s691_s3, 2048 }
  0x25   :  { %s44_s21 = sshll.u32 %s581_s20, 4  ;;  %p526_p2 = scmp.ne.s32.totalorder %s691_s3, %s525_s24  ;;  %s45_s21 = int_to_ptr.vmem [resolvable:$true] %s44_s21 }
  0x26   :  { %p529_p3 = scmp.lt.u32.totalorder %s525_s24, %s691_s3 }
  0x28   :  { %p531_p4 = pnand %p529_p3, %p526_p2 }
  0x2a   :  { %534 = shalt.err (!%p531_p4)
}
  0x2b   :  { %s535_s29 = scalar_lea.vmem %s45_s21, 2048  ;;  %p540_p6 = scmp.lt.s32.totalorder %s45_s21, %s45_s21 }
  0x2c   :  { %p536_p5 = scmp.ne.s32.totalorder %s45_s21, %s535_s29  ;;  %p541_p7 = scmp.lt.s32.totalorder %s535_s29, %s535_s29 }
  0x2e   :  { %p542_p8 = por %p541_p7, %p540_p6 }
  0x30   :  { %p543_p9 = pnand %p542_p8, %p536_p5 }
  0x32   :  { %546 = shalt.err (!%p543_p9)
}
  0x33   :  { %50 = dma.hbm_to_vmem [thread:$0]  %s691_s3, 2048, %s45_s21, [#allocation7], %s579_s1, %s579_s1, %s580_s17  }
  0x34   :  { %569 = dma.done.wait [#allocation4], 384  }
  0x35   :  { %570 = vsyncadd [#allocation4], 4294966912 }
  0x36   :  { %571 = dma.done.wait [#allocation7], 3584  }
  0x37   :  { %572 = vsyncadd [#allocation7], 4294963712  ;;  %v582_v0 = vmov 0.0   ;;  %v73_v1 = vld [vmem:[#allocation6 + $0x8] sm:$0xff]  ;;  %v75_v2 = vld [vmem:[#allocation6 + $0x18] sm:$0xff]  ;;  %vm96_vm0 = vcmask 392192   ;;  %v86_v47 = vlaneseq }
  0x38   :  { %170 = vmatprep.mubr.f32.mxu0 %v582_v0  ;;  %v72_v3 = vld [vmem:[#allocation6] sm:$0xff]  ;;  %v422_v4 = vpack.c.bf16 %v75_v2, %v73_v1  ;;  %v74_v5 = vld [vmem:[#allocation6 + $0x10] sm:$0xff]  ;;  %v77_v6 = vld [vmem:[#allocation6 + $0x28] sm:$0xff]  ;;  %v583_v25 = vmov 0.0|0.0   ;;  %vm584_vm1 = vmmov 0   ;;  %s585_s8 = smov [#allocation9]  }
  0x39   :  { %v79_v7 = vld [vmem:[#allocation6 + $0x38] sm:$0xff]  ;;  %v424_v8 = vpack.c.bf16 %v74_v5, %v72_v3  ;;  %v76_v10 = vld [vmem:[#allocation6 + $0x20] sm:$0xff]  ;;  %v78_v11 = vld [vmem:[#allocation6 + $0x30] sm:$0xff]  ;;  %434 = vmatprep.subr.bf16.mxu1 %v583_v25  ;;  %413 = vmatprep.mubr.msk.f32.mxu1 %vm584_vm1, %v582_v0  ;;  %v87_v48 = vshrl.u32 %v86_v47, 7  ;;  %s342_s9 = sshll.u32 %s585_s8, 4  ;;  %s343_s9 = int_to_ptr.vmem [resolvable:$true] %s342_s9 }
  0x3a   :  { %v426_v9 = vpack.c.bf16 %v79_v7, %v77_v6  ;;  %v81_v12 = vld [vmem:[#allocation6 + $0x48] sm:$0xff]  ;;  %423 = vmatprep.subr.bf16.mxu0 %v422_v4  ;;  %v83_v13 = vld [vmem:[#allocation6 + $0x58] sm:$0xff]  ;;  %v428_v14 = vpack.c.bf16 %v78_v11, %v76_v10  ;;  %v80_v16 = vld [vmem:[#allocation6 + $0x40] sm:$0xff]  ;;  %s547_s10 = scalar_lea.vmem %s343_s9, 384  ;;  %p552_p11 = scmp.lt.s32.totalorder %s343_s9, %s343_s9 }
  0x3b   :  { %425 = vmatpush1.bf16.msra.mxu0 %v424_v8  ;;  %v430_v15 = vpack.c.bf16 %v83_v13, %v81_v12  ;;  %v82_v17 = vld [vmem:[#allocation6 + $0x50] sm:$0xff]  ;;  %v69_v19 = vld [vmem:[#allocation3] sm:$0xff]  ;;  %v71_v21 = vld [vmem:[#allocation3 + $0x10] sm:$0xff]  ;;  %v88_v49 = vsub.s32 0, %v87_v48  ;;  %v92_v5 = vsub.s32 1, %v87_v48  ;;  %p548_p10 = scmp.ne.s32.totalorder %s343_s9, %s547_s10  ;;  %p553_p12 = scmp.lt.s32.totalorder %s547_s10, %s547_s10 }
  0x3c   :  { %427 = vmatprep.subr.bf16.mxu0 %v426_v9  ;;  %v432_v18 = vpack.c.bf16 %v82_v17, %v80_v16  ;;  %v70_v20 = vld [vmem:[#allocation3 + $0x8] sm:$0xff]  ;;  %v216_v22 = vld [vmem:[#allocation8] sm:$0xff]  ;;  %v217_v23 = vld [vmem:[#allocation8 + $0x8] sm:$0xff] }
  0x3d   :  { %v435_v24 = vpack.c.bf16 %v217_v23, %v216_v22  ;;  %v218_v26 = vld [vmem:[#allocation8 + $0x10] sm:$0xff]  ;;  %v219_v27 = vld [vmem:[#allocation8 + $0x18] sm:$0xff]  ;;  %v220_v29 = vld [vmem:[#allocation8 + $0x20] sm:$0xff]  ;;  %p554_p13 = por %p553_p12, %p552_p11 }
  0x3e   :  { %v438_v28 = vpack.c.bf16 %v219_v27, %v218_v26  ;;  %v221_v30 = vld [vmem:[#allocation8 + $0x28] sm:$0xff]  ;;  %v222_v32 = vld [vmem:[#allocation8 + $0x30] sm:$0xff]  ;;  %v223_v33 = vld [vmem:[#allocation8 + $0x38] sm:$0xff] }
  0x3f   :  { %429 = vmatpush1.bf16.msra.mxu0 %v428_v14  ;;  %436 = vmatpush3.bf16.msra.mxu1 %v435_v24  ;;  %v441_v31 = vpack.c.bf16 %v221_v30, %v220_v29  ;;  %v444_v34 = vpack.c.bf16 %v223_v33, %v222_v32  ;;  %v224_v35 = vld [vmem:[#allocation8 + $0x40] sm:$0xff]  ;;  %v225_v36 = vld [vmem:[#allocation8 + $0x48] sm:$0xff]  ;;  %v226_v38 = vld [vmem:[#allocation8 + $0x50] sm:$0xff]  ;;  %p555_p0 = pnand %p554_p13, %p548_p10 }
  0x40   :  { %431 = vmatprep.subr.bf16.mxu0 %v430_v15  ;;  %437 = vmatprep.subr.bf16.mxu1 %v583_v25  ;;  %v447_v37 = vpack.c.bf16 %v225_v36, %v224_v35  ;;  %v227_v39 = vld [vmem:[#allocation8 + $0x58] sm:$0xff]  ;;  %v228_v41 = vld [vmem:[#allocation8 + $0x60] sm:$0xff]  ;;  %v229_v42 = vld [vmem:[#allocation8 + $0x68] sm:$0xff] }
  0x41   :  { %v450_v40 = vpack.c.bf16 %v227_v39, %v226_v38  ;;  %v453_v43 = vpack.c.bf16 %v229_v42, %v228_v41  ;;  %v230_v44 = vld [vmem:[#allocation8 + $0x70] sm:$0xff]  ;;  %v231_v45 = vld [vmem:[#allocation8 + $0x78] sm:$0xff]  ;;  %v84_v50 = vld [vmem:[%s690_s2] sm:$0x3] }
  0x42   :  { %v456_v46 = vpack.c.bf16 %v231_v45, %v230_v44  ;;  %v89_v51 = vrot.slane %v84_v50, %v88_v49  ;;  %v93_v8 = vrot.slane %v84_v50, %v92_v5 }
  0x43   :  { %433 = vmatpush1.bf16.msra.mxu0 %v432_v18  ;;  %439 = vmatpush3.bf16.msra.mxu1 %v438_v28 }
  0x44   :  { %440 = vmatprep.subr.bf16.mxu1 %v583_v25 }
  0x46   :  { %355 = vmatmul.mubr.msk.f32.vlgmr.msra.gmra.mrb[0].mxu0 %vm96_vm0, %v69_v19 }
  0x47   :  { %176 = vmatprep.mubr.f32.mxu0 %v582_v0  ;;  %442 = vmatpush3.bf16.msra.mxu1 %v441_v31 }
  0x48   :  { %443 = vmatprep.subr.bf16.mxu1 %v583_v25 }
  0x4a   :  { %356 = vmatmul.mubr.msk.f32.gmra.mrb[2].mxu0 %vm96_vm0, %v70_v20 }
  0x4b   :  { %182 = vmatprep.mubr.f32.mxu0 %v582_v0  ;;  %445 = vmatpush3.bf16.msra.mxu1 %v444_v34 }
  0x4c   :  { %446 = vmatprep.subr.bf16.mxu1 %v583_v25 }
  0x4e   :  { %357 = vmatmul.mubr.msk.f32.gmra.mrb[4].mxu0 %vm96_vm0, %v71_v21  ;;  %v361_v21 = vld [vmem:[%s692_s4] ss:$0 sm:$0xff] }
  0x4f   :  { %448 = vmatpush3.bf16.msra.mxu1 %v447_v37 }
  0x50   :  { %449 = vmatprep.subr.bf16.mxu1 %v583_v25 }
  0x53   :  { %451 = vmatpush3.bf16.msra.mxu1 %v450_v40 }
  0x54   :  { %452 = vmatprep.subr.bf16.mxu1 %v583_v25 }
  0x57   :  { %454 = vmatpush3.bf16.msra.mxu1 %v453_v43 }
  0x58   :  { %455 = vmatprep.subr.bf16.mxu1 %v583_v25 }
  0x5b   :  { %457 = vmatpush3.bf16.msra.mxu1 %v456_v46 }
 0x119   :  { %v172_v52 = vpop.f32.mrb[0].mxu0 }
 0x11a   :  { %v173_v53 = vadd.f32 %v172_v52, %v89_v51  ;;  %v174_v54 = vpop.f32.mrb[1].mxu0 }
 0x11b   :  { %v175_v11 = vadd.f32 %v174_v54, %v93_v8 }
 0x11c   :  { %v358_v55 = vmul.f32 -1.442695, %v173_v53 }
 0x11d   :  { %v178_v56 = vpop.f32.mrb[2].mxu0 }
 0x11e   :  { %469 = vpow2.f32 %v358_v55  ;;  %v179_v57 = vadd.f32 %v178_v56, %v89_v51  ;;  %v180_v58 = vpop.f32.mrb[3].mxu0 }
 0x11f   :  { %v181_v15 = vadd.f32 %v180_v58, %v93_v8 }
 0x120   :  { %v359_v59 = vmul.f32 -1.442695, %v179_v57 }
 0x121   :  { %v184_v60 = vpop.f32.mrb[4].mxu0 }
 0x122   :  { %471 = vpow2.f32 %v359_v59  ;;  %v185_v61 = vadd.f32 %v184_v60, %v89_v51  ;;  %v186_v62 = vpop.f32.mrb[5].mxu0 }
 0x123   :  { %v187_v19 = vadd.f32 %v186_v62, %v93_v8 }
 0x124   :  { %v360_v63 = vmul.f32 -1.442695, %v185_v61 }
 0x126   :  { %473 = vpow2.f32 %v360_v63 }
 0x128   :  { %v470_v1 = vpop.eup %469 }
 0x129   :  { %v198_v2 = vadd.f32 1.0, %v470_v1 }
 0x12b   :  { %475 = vrcp.f32 %v198_v2 }
 0x12c   :  { %v472_v3 = vpop.eup %471 }
 0x12d   :  { %v199_v4 = vadd.f32 1.0, %v472_v3 }
 0x12f   :  { %477 = vrcp.f32 %v199_v4 }
 0x130   :  { %v474_v6 = vpop.eup %473 }
 0x131   :  { %v200_v7 = vadd.f32 1.0, %v474_v6 }
 0x133   :  { %479 = vrcp.f32 %v200_v7 }
 0x135   :  { %v476_v9 = vpop.eup %475 }
 0x136   :  { %v207_v10 = vmul.f32 %v476_v9, %v173_v53 }
 0x138   :  { %v210_v12 = vmul.f32 %v207_v10, %v175_v11 }
 0x139   :  { %v478_v13 = vpop.eup %477 }
 0x13a   :  { %v208_v14 = vmul.f32 %v478_v13, %v179_v57  ;;  %414 = vmatmul.mubr.f32.vlgmr.msra.gmra.mrb[0].mxu1 %v210_v12 }
 0x13b   :  { %416 = vmatprep.mubr.msk.f32.mxu1 %vm584_vm1, %v582_v0 }
 0x13c   :  { %v211_v16 = vmul.f32 %v208_v14, %v181_v15 }
 0x13d   :  { %v480_v17 = vpop.eup %479 }
 0x13e   :  { %v209_v18 = vmul.f32 %v480_v17, %v185_v61  ;;  %417 = vmatmul.mubr.f32.gmra.mrb[2].mxu1 %v211_v16 }
 0x13f   :  { %419 = vmatprep.mubr.msk.f32.mxu1 %vm584_vm1, %v582_v0 }
 0x140   :  { %v212_v20 = vmul.f32 %v209_v18, %v187_v19 }
 0x142   :  { %420 = vmatmul.mubr.f32.gmra.mrb[4].mxu1 %v212_v20 }
 0x20d   :  { %v298_v22 = vpop.f32.mrb[0].mxu1 }
 0x20e   :  { %v331_v23 = vadd.f32 %v361_v21, %v298_v22  ;;  %v415_v24 = vpop.f32.mrb[1].mxu1 }
 0x210   :  { %334 = vst [vmem:[#allocation9] sm:$0xff] %v331_v23 }
 0x211   :  { %v303_v25 = vpop.f32.mrb[2].mxu1 }
 0x212   :  { %v332_v26 = vadd.f32 %v361_v21, %v303_v25  ;;  %v418_v27 = vpop.f32.mrb[3].mxu1 }
 0x214   :  { %335 = vst [vmem:[#allocation9 + $0x8] sm:$0xff] %v332_v26 }
 0x215   :  { %v308_v28 = vpop.f32.mrb[4].mxu1 }
 0x216   :  { %v333_v29 = vadd.f32 %v361_v21, %v308_v28  ;;  %v421_v30 = vpop.f32.mrb[5].mxu1 }
 0x218   :  { %336 = vst [vmem:[#allocation9 + $0x10] sm:$0xff] %v333_v29 }
 0x219   :  { %558 = shalt.err (!%p555_p0)
}
 0x21a   :  { %s559_s12 = scalar_lea.hbm %s693_s5, 384 }
 0x21b   :  { %p560_p1 = scmp.ne.s32.totalorder %s693_s5, %s559_s12  ;;  %p563_p2 = scmp.lt.u32.totalorder %s559_s12, %s693_s5 }
 0x21d   :  { %p565_p3 = pnand %p563_p2, %p560_p1 }
 0x21f   :  { %568 = shalt.err (!%p565_p3)
}
 0x220   :  { %348 = dma.vmem_to_hbm [thread:$0]  %s343_s9, 384, %s693_s5, [#allocation5], %s579_s1, %s579_s1, %s580_s17  }
 0x221   :  { %573 = dma.done.wait [#allocation5], 384  }
 0x222   :  { %574 = vsyncadd [#allocation5], 4294966912 }
 0x223   :  { %352 = vsyncpa [#allocation4], 1 }
 0x224   :  { %353 = vsyncpa [#allocation7], 1 }
 0x225   :  { %354 = vsyncpa [#allocation5], 1 }

</bundles_post_ra>
